<compile_context>
chip_gen: v5e
topology: v5e:2x2
jax: 0.10.0
libtpu: 0.0.40
codegen_flags: <defaults>
</compile_context>

<pallas_src>
import functools
import math

import jax
import jax.numpy as jnp
from jax.experimental import pallas as pl
from jax.experimental.pallas import tpu as pltpu


def _min_level_norm_kernel(x_ref, o_ref, *, scale):
    # Fused affine + clip:  clip(x * (-2/min_level_db) + 1, -1, 1)
    # (2 VALU ops + 2 clip ops per vreg instead of 4 + 2.)
    x = x_ref[...]
    y = jnp.clip(x * scale + 1.0, -1.0, 1.0)
    o_ref[...] = y.astype(o_ref.dtype)


def _choose_layout(n_elems, last_dim, itemsize, tile_bytes):
    """Pick a lane-dense (rows, lanes) view and a hardware-driven row-tile size."""
    # Lane width: widest multiple of 128 (capped at 2048) dividing the flat size.
    lanes = None
    for cand in (2048, 1024, 512, 256, 128):
        if n_elems % cand == 0:
            lanes = cand
            break
    if lanes is None:
        # Fallback: keep the original trailing dim (always divides n_elems).
        # Correct; only costs masked partial stores if last_dim % 128 != 0.
        lanes = last_dim
    rows = n_elems // lanes

    # Sublane packing granularity: f32 -> 8, bf16/f16 -> 16, int8/fp8 -> 32.
    sub = max(8, 32 // max(1, itemsize))
    target_rows = max(1, tile_bytes // (lanes * itemsize))
    if rows <= max(target_rows, sub):
        tile_rows = rows  # single full-extent block along rows (always legal)
    else:
        tile_rows = max(sub, (target_rows // sub) * sub)
    return rows, lanes, tile_rows


def min_level_norm(x: jax.Array, min_level_db: float,
                   *, tile_bytes: int = 2 * 1024 * 1024) -> jax.Array:
    """Applies MinLevelNorm elementwise to x of any shape/dtype (forward pass)."""
    orig_shape = x.shape
    n = math.prod(orig_shape)
    itemsize = jnp.dtype(x.dtype).itemsize
    last_dim = orig_shape[-1] if orig_shape else 1
    rows, lanes, tile_rows = _choose_layout(n, last_dim, itemsize, tile_bytes)

    x2d = x.reshape(rows, lanes)  # pure layout plumbing (row-major view)
    grid = (pl.cdiv(rows, tile_rows),)

    scale = -2.0 / float(min_level_db)
    kernel = functools.partial(_min_level_norm_kernel, scale=scale)

    y2d = pl.pallas_call(
        kernel,
        out_shape=jax.ShapeDtypeStruct((rows, lanes), x.dtype),
        grid_spec=pltpu.PrefetchScalarGridSpec(
            num_scalar_prefetch=0,
            grid=grid,
            # TODO(synk): optionally sweep pipeline_mode=pl.Buffered(3) on the
            # input spec (single-digit % at most at these tile sizes).
            in_specs=[pl.BlockSpec((tile_rows, lanes), lambda r: (r, 0))],
            out_specs=pl.BlockSpec((tile_rows, lanes), lambda r: (r, 0)),
        ),
        compiler_params=pltpu.CompilerParams(
            dimension_semantics=("parallel",),
            vmem_limit_bytes=32 * 1024 * 1024,
        ),
    )(x2d)
    return y2d.reshape(orig_shape)


def _reference(x, min_level_db):
    x = (x - min_level_db) / -min_level_db
    x = x * 2.0 - 1.0
    return jnp.clip(x, -1.0, 1.0)


if __name__ == "__main__":
    min_level_db = -100.0
    key = jax.random.PRNGKey(0)

    # 1) (batch, time, feats) f32 dB-spectrogram; flat size divisible by 2048
    #    -> lane-dense wide-slab path, single tile.
    x1 = jax.random.uniform(key, (2, 8, 128), dtype=jnp.float32,
                            minval=-120.0, maxval=10.0)
    y1 = jax.block_until_ready(min_level_norm(x1, min_level_db))
    assert jnp.allclose(y1, _reference(x1, min_level_db), atol=1e-6), "case1"

    # 2) Multi-step parallel grid: small tile_bytes forces several row tiles
    #    (exercises (8k, 2048) tiling + boundary-block masking).
    x2 = jax.random.uniform(jax.random.fold_in(key, 1), (4, 40, 128),
                            dtype=jnp.float32, minval=-120.0, maxval=10.0)
    y2 = jax.block_until_ready(
        min_level_norm(x2, min_level_db, tile_bytes=64 * 1024))
    assert jnp.allclose(y2, _reference(x2, min_level_db), atol=1e-6), "case2"

    # 3) bf16 path: compute stays in bf16 (half the HBM traffic).
    x3 = jax.random.uniform(jax.random.fold_in(key, 2), (2, 16, 128),
                            dtype=jnp.float32, minval=-120.0,
                            maxval=10.0).astype(jnp.bfloat16)
    y3 = jax.block_until_ready(min_level_norm(x3, min_level_db))
    ref3 = _reference(x3.astype(jnp.float32), min_level_db)
    assert jnp.allclose(y3.astype(jnp.float32), ref3, atol=2e-2), "case3"

    # 4) Doctest from the module docstring: [-50., -20., -80.] -> [0., .6, -.6]
    doc_x = jnp.array([-50.0, -20.0, -80.0], dtype=jnp.float32)
    doc_y = jax.block_until_ready(min_level_norm(doc_x, min_level_db))
    assert jnp.allclose(doc_y, jnp.array([0.0, 0.6, -0.6]), atol=1e-6), "case4"

    print("KERNEL_OK")
</pallas_src>

<mosaic_0001>
module attributes {stable_mosaic.version = 11 : i64} {
  func.func @_min_level_norm_kernel(%arg0: i32, %arg1: memref<1x2048xf32, #tpu.memory_space<vmem>>, %arg2: memref<1x2048xf32, #tpu.memory_space<vmem>>) attributes {dimension_semantics = [#tpu.dimension_semantics<parallel>], iteration_bounds = array<i64: 1>, scalar_prefetch = 0 : i64, scratch_operands = 0 : i64, tpu.core_type = #tpu.core_type<tc>, window_params = [{transform_indices = @transform_0, window_bounds = array<i64: 1, 2048>}, {transform_indices = @transform_1, window_bounds = array<i64: 1, 2048>}]} {
    %c0 = arith.constant 0 : index
    %c0_0 = arith.constant 0 : index
    %0 = vector.load %arg1[%c0, %c0_0] : memref<1x2048xf32, #tpu.memory_space<vmem>>, vector<1x2048xf32>
    %cst = arith.constant 2.000000e-02 : f32
    %1 = vector.broadcast %cst : f32 to vector<1x2048xf32>
    %2 = arith.mulf %0, %1 : vector<1x2048xf32>
    %cst_1 = arith.constant 1.000000e+00 : f32
    %3 = vector.broadcast %cst_1 : f32 to vector<1x2048xf32>
    %4 = arith.addf %2, %3 : vector<1x2048xf32>
    %cst_2 = arith.constant -1.000000e+00 : f32
    %cst_3 = arith.constant 1.000000e+00 : f32
    %5 = vector.broadcast %cst_2 : f32 to vector<1x2048xf32>
    %6 = arith.maximumf %5, %4 : vector<1x2048xf32>
    %7 = vector.broadcast %cst_3 : f32 to vector<1x2048xf32>
    %8 = arith.minimumf %7, %6 : vector<1x2048xf32>
    %c0_4 = arith.constant 0 : index
    %c0_5 = arith.constant 0 : index
    %9 = vector.load %arg2[%c0_4, %c0_5] : memref<1x2048xf32, #tpu.memory_space<vmem>>, vector<1x2048xf32>
    tpu.vector_store %arg2[%c0_4, %c0_5], %8 {strides = array<i32>} : memref<1x2048xf32, #tpu.memory_space<vmem>>, vector<1x2048xf32>,
    return
  }
  func.func @transform_0(%arg0: i32) -> (i32, i32) {
    %c0_i32 = arith.constant 0 : i32
    %c0_i32_0 = arith.constant 0 : i32
    return %arg0, %c0_i32 : i32, i32
  }
  func.func @transform_1(%arg0: i32) -> (i32, i32) {
    %c0_i32 = arith.constant 0 : i32
    %c0_i32_0 = arith.constant 0 : i32
    return %arg0, %c0_i32 : i32, i32
  }
}

</mosaic_0001>

<bundles_post_ra>
// kernel: tpu_custom_call.1
= control target key start
LH: loop header
LB: loop body
LE: loop exit
PB: predicated region body
PF: predicated region fallthrough
CT: control target
= control target key end

     0   :  { %6 = vsyncpa [#allocation3], 0  ;;  %s126_s0 = inlined_call_operand.hbm [shape: f32[1,2048], index: 0, kind: input, shape index: {}]   ;;  %s127_s1 = inlined_call_operand.hbm [shape: f32[1,2048], index: 1, kind: output, shape index: {}]  }
   0x1   :  { %7 = vsyncpa [#allocation4], 0  ;;  %s13_s8 = sshll.u32 %s126_s0, 4  ;;  %s108_s9 = smov [#allocation2]   ;;  %s14_s8 = int_to_ptr.hbm [resolvable:$true] %s13_s8 }
   0x2   :  { %s15_s10 = sshll.u32 %s108_s9, 4  ;;  %s16_s10 = int_to_ptr.vmem [resolvable:$true] %s15_s10 }
   0x3   :  { %18 = dma.hbm_to_vmem [thread:$0]  %s14_s8, 256, %s16_s10, [#allocation3]  }
   0x4   :  { %104 = dma.done.wait [#allocation3], 256  }
   0x5   :  { %105 = vsyncadd [#allocation3], 4294967040  ;;  %v23_v0 = vld [vmem:[#allocation2] sm:$0xff]  ;;  %v24_v1 = vld [vmem:[#allocation2 + $0x8] sm:$0xff]  ;;  %s109_s11 = smov [#allocation5]   ;;  %s42_s15 = sshll.u32 %s127_s1, 4  ;;  %s43_s15 = int_to_ptr.hbm [resolvable:$true] %s42_s15 }
   0x6   :  { %v25_v2 = vmul.f32 0.02, %v23_v0  ;;  %v26_v3 = vmul.f32 0.02, %v24_v1  ;;  %s40_s12 = sshll.u32 %s109_s11, 4  ;;  %s41_s12 = int_to_ptr.vmem [resolvable:$true] %s40_s12 }
   0x8   :  { %v27_v4 = vadd.f32 1.0, %v25_v2  ;;  %v28_v5 = vadd.f32 1.0, %v26_v3 }
   0xa   :  { %v52_v6 = vclamps-f32 %v27_v4, 1.0  ;;  %v53_v7 = vclamps-f32 %v28_v5, 1.0 }
   0xc   :  { %33 = vst [vmem:[#allocation5] sm:$0xff] %v52_v6 }
   0xd   :  { %34 = vst [vmem:[#allocation5 + $0x8] sm:$0xff] %v53_v7 }
   0xe   :  { %45 = dma.vmem_to_hbm [thread:$0]  %s41_s12, 256, %s43_s15, [#allocation4]  }
   0xf   :  { %106 = dma.done.wait [#allocation4], 256  }
  0x10   :  { %107 = vsyncadd [#allocation4], 4294967040 }
  0x11   :  { %50 = vsyncpa [#allocation3], 1 }
  0x12   :  { %51 = vsyncpa [#allocation4], 1 }

</bundles_post_ra>
